<compile_context>
chip_gen: v6e
topology: v6e:2x2x1
jax: 0.10.0
libtpu: 0.0.40
codegen_flags: <defaults>
</compile_context>

<pallas_src>
import math
import functools

import jax
import jax.numpy as jnp
from jax import lax
from jax.experimental import pallas as pl
from jax.experimental.pallas import tpu as pltpu


def _erf(x):
    # Abramowitz & Stegun 7.1.26 rational approximation (|err| <= 1.5e-7 in f32).
    # The divide goes through pl.reciprocal -> EUP slot instead of a VALU divide.
    a1, a2, a3, a4, a5 = 0.254829592, -0.284496736, 1.421413741, -1.453152027, 1.061405429
    p = 0.3275911
    s = jnp.where(x >= 0.0, 1.0, -1.0)
    ax = jnp.abs(x)
    t = pl.reciprocal(1.0 + p * ax, approx=True)
    poly = ((((a5 * t + a4) * t + a3) * t + a2) * t + a1) * t
    return s * (1.0 - poly * jnp.exp(-ax * ax))


def _layernorm(x, g, b, eps=1e-5):
    mu = jnp.mean(x, axis=-1, keepdims=True)
    var = jnp.mean((x - mu) ** 2, axis=-1, keepdims=True)
    return (x - mu) * lax.rsqrt(var + eps) * g + b


def _block_kernel(x_ref, bias_ref,
                  g1_ref, b1_ref,
                  wq_ref, wk_ref, wv_ref, wo_ref, bo_ref,
                  g2_ref, b2_ref,
                  wff1_ref, bff1_ref, wffo_ref, bffo_ref,
                  o_ref, *, heads, ff_inner, masked):
    mxu = jnp.bfloat16
    M, D = x_ref.shape
    x = x_ref[...]                                               # (M, D) f32

    # ---- norm1 + multi-head self-attention (head-batched, no lane slicing) ----
    xn = _layernorm(x, g1_ref[...], b1_ref[...]).astype(mxu)     # (M, D)
    xn_h = jnp.broadcast_to(xn[None], (heads, M, D))             # (H, M, D) bf16
    proj_dims = (((2,), (1,)), ((0,), (0,)))                     # batch over heads
    q = lax.dot_general(xn_h, wq_ref[...], proj_dims,
                        preferred_element_type=jnp.float32)      # (H, M, dh) (scale folded)
    k = lax.dot_general(xn_h, wk_ref[...], proj_dims,
                        preferred_element_type=jnp.float32)
    v = lax.dot_general(xn_h, wv_ref[...], proj_dims,
                        preferred_element_type=jnp.float32)

    # scores: (H, M, dh) x (H, M, dh) -> (H, M, M)
    sim = lax.dot_general(q.astype(mxu), k.astype(mxu),
                          (((2,), (2,)), ((0,), (0,))),
                          preferred_element_type=jnp.float32)
    if masked:
        # Several batches folded into M: additive block-diagonal-over-batch mask.
        sim = sim + bias_ref[...]
    sim = sim - jnp.max(sim, axis=-1, keepdims=True)
    e = jnp.exp(sim)
    probs = e * pl.reciprocal(jnp.sum(e, axis=-1, keepdims=True), approx=True)

    o = lax.dot_general(probs.astype(mxu), v.astype(mxu),
                        (((2,), (1,)), ((0,), (0,))),
                        preferred_element_type=jnp.float32)      # (H, M, dh)
    per_head = lax.dot_general(o.astype(mxu), wo_ref[...],
                               (((2,), (1,)), ((0,), (0,))),
                               preferred_element_type=jnp.float32)   # (H, M, D)
    attn_out = jnp.sum(per_head, axis=0)                         # (M, D), cheap vreg adds
    x1 = attn_out + bo_ref[...] + x                              # to_out bias + residual

    # ---- norm2 + GEGLU feed-forward (fused value|gate projection) ----
    xn2 = _layernorm(x1, g2_ref[...], b2_ref[...])
    h12 = jnp.dot(xn2.astype(mxu), wff1_ref[...],
                  preferred_element_type=jnp.float32) + bff1_ref[...]    # (M, 2*ffi)
    hx = h12[:, :ff_inner]                                       # 128-lane aligned slices
    hg = h12[:, ff_inner:]
    gelu_g = 0.5 * hg * (1.0 + _erf(hg * (1.0 / math.sqrt(2.0))))
    ff = jnp.dot((hx * gelu_g).astype(mxu), wffo_ref[...],
                 preferred_element_type=jnp.float32) + bffo_ref[...]
    o_ref[...] = (x1 + ff).astype(o_ref.dtype)


def pack_params(params):
    """One-time weight packing (bf16 cast, scale fold, GEGLU fuse) -- call once, not per step."""
    mxu = jnp.bfloat16
    d_head = params["wq"].shape[-1]
    scale = d_head ** -0.5
    return {
        "g1": params["g1"], "b1": params["b1"],
        "wq": (params["wq"] * scale).astype(mxu),     # (H, D, dh), attention scale folded in
        "wk": params["wk"].astype(mxu),               # (H, D, dh)
        "wv": params["wv"].astype(mxu),               # (H, D, dh)
        "wo": params["wo"].astype(mxu),               # (H, dh, D)
        "bo": params["bo"],
        "g2": params["g2"], "b2": params["b2"],
        "wff1": jnp.concatenate([params["wfx"], params["wfg"]], axis=1).astype(mxu),  # (D, 2*ffi)
        "bff1": jnp.concatenate([params["bfx"], params["bfg"]], axis=1),              # (1, 2*ffi)
        "wffo": params["wfo"].astype(mxu),            # (ffi, D)
        "bffo": params["bfo"],
    }


_PARAM_ORDER = ("g1", "b1", "wq", "wk", "wv", "wo", "bo",
                "g2", "b2", "wff1", "bff1", "wffo", "bffo")


def _num_grid_steps(batch):
    # v7x has 2 TensorCores/chip -> keep >= 2 "parallel" grid steps so both get work.
    # v5e / v6e are single-TC: the grid is a serial loop (~0.35 us/step overhead), so
    # collapse to one step and fold the whole batch into the matmul M dim instead.
    try:
        kind = jax.devices()[0].device_kind.lower()
    except Exception:
        kind = ""
    single_tc = any(t in kind for t in ("v5 lite", "v5e", "v6 lite", "v6e", "trillium"))
    if batch <= 1 or single_tc:
        return 1
    return 2 if batch % 2 == 0 else 1


def basic_transformer_block(x, packed, *, num_steps=None):
    B, N, D = x.shape
    H = packed["wq"].shape[0]
    ff_inner = packed["wffo"].shape[0]
    if num_steps is None:
        num_steps = _num_grid_steps(B)
    assert B % num_steps == 0
    bb = B // num_steps              # batches folded into one grid step
    M = bb * N                       # matmul M dim per grid step

    # Flatten batch*seq wrapper-side so the kernel sees 2-D slabs (no in-kernel reshapes
    # of pipelined blocks); un-flatten on the way out.
    x2 = x.reshape(B * N, D)

    # Additive block-diagonal-over-batch score mask: 0 within a batch, -1e30 across.
    blk = jnp.kron(jnp.eye(bb, dtype=jnp.float32), jnp.ones((N, N), jnp.float32))
    attn_bias = jnp.where(blk > 0.5, 0.0, -1e30).astype(jnp.float32)      # (M, M)

    weights = [packed[k] for k in _PARAM_ORDER]
    full = lambda a: pl.BlockSpec(a.shape, lambda i, _nd=a.ndim: (0,) * _nd)

    kernel = functools.partial(_block_kernel, heads=H, ff_inner=ff_inner,
                               masked=(bb > 1))
    out = pl.pallas_call(
        kernel,
        out_shape=jax.ShapeDtypeStruct((B * N, D), x.dtype),
        grid=(num_steps,),
        in_specs=[pl.BlockSpec((M, D), lambda i: (i, 0)),
                  full(attn_bias)]
                 + [full(w) for w in weights],
        out_specs=pl.BlockSpec((M, D), lambda i: (i, 0)),
        compiler_params=pltpu.CompilerParams(dimension_semantics=("parallel",)),
    )(x2, attn_bias, *weights)
    return out.reshape(B, N, D)


# ---------------------------------------------------------------------------
# Pure-JAX f32 reference (mirrors the PyTorch math) for verification.
# ---------------------------------------------------------------------------
def reference_forward(x, p):
    def ln(t, g, b):
        mu = t.mean(-1, keepdims=True)
        var = ((t - mu) ** 2).mean(-1, keepdims=True)
        return (t - mu) / jnp.sqrt(var + 1e-5) * g + b

    dh = p["wq"].shape[-1]
    xn = ln(x, p["g1"], p["b1"])
    q = jnp.einsum("bnd,hdk->bhnk", xn, p["wq"])
    k = jnp.einsum("bnd,hdk->bhnk", xn, p["wk"])
    v = jnp.einsum("bnd,hdk->bhnk", xn, p["wv"])
    sim = jnp.einsum("bhik,bhjk->bhij", q, k) * dh ** -0.5
    attn = jax.nn.softmax(sim, axis=-1)
    o = jnp.einsum("bhij,bhjk->bhik", attn, v)
    attn_out = jnp.einsum("bhik,hkd->bid", o, p["wo"]) + p["bo"]
    x1 = attn_out + x
    xn2 = ln(x1, p["g2"], p["b2"])
    hx = xn2 @ p["wfx"] + p["bfx"]
    hg = xn2 @ p["wfg"] + p["bfg"]
    ff = (hx * jax.nn.gelu(hg, approximate=False)) @ p["wfo"] + p["bfo"]
    return x1 + ff


def make_params(key, dim, heads, d_head, ff_mult=4):
    ff_inner = dim * ff_mult
    ks = jax.random.split(key, 8)
    n = lambda k, shape, s=0.05: (s * jax.random.normal(k, shape)).astype(jnp.float32)
    return {
        # layernorms (PyTorch default init: weight=1, bias=0)
        "g1": jnp.ones((1, dim), jnp.float32), "b1": jnp.zeros((1, dim), jnp.float32),
        "g2": jnp.ones((1, dim), jnp.float32), "b2": jnp.zeros((1, dim), jnp.float32),
        # attention projections, stored per-head as (heads, dim, d_head)
        "wq": n(ks[0], (heads, dim, d_head)),
        "wk": n(ks[1], (heads, dim, d_head)),
        "wv": n(ks[2], (heads, dim, d_head)),
        # to_out: (heads, d_head, dim) + bias
        "wo": n(ks[3], (heads, d_head, dim)), "bo": n(ks[4], (1, dim)),
        # GEGLU proj split into value / gate halves, then output projection
        "wfx": n(ks[5], (dim, ff_inner)), "bfx": jnp.zeros((1, ff_inner), jnp.float32),
        "wfg": n(ks[6], (dim, ff_inner)), "bfg": jnp.zeros((1, ff_inner), jnp.float32),
        "wfo": n(ks[7], (ff_inner, dim)), "bfo": jnp.zeros((1, dim), jnp.float32),
    }


if __name__ == "__main__":
    # Small shapes consistent with the module: dim=32, n_heads=4, d_head=8.
    B, N, dim, heads, d_head = 2, 8, 32, 4, 8

    key = jax.random.PRNGKey(0)
    kx, kp = jax.random.split(key)
    x = jax.random.normal(kx, (B, N, dim), dtype=jnp.float32)
    params = make_params(kp, dim, heads, d_head)

    # TODO(synk): dropout layers and torch.utils.checkpoint are training-time no-ops for
    # this forward pass and are intentionally omitted.
    packed = pack_params(params)                       # pack once, outside the per-call path
    fwd = jax.jit(basic_transformer_block)
    out = jax.block_until_ready(fwd(x, packed))

    ref = reference_forward(x, params)
    assert out.shape == (B, N, dim)
    # Tolerance widened vs. pure-f32 because MXU operands are bf16 (f32 accumulate) and
    # softmax / erf use the approx EUP reciprocal; observed error is a few e-3.
    assert jnp.allclose(out, ref, rtol=1e-2, atol=1e-2), float(jnp.max(jnp.abs(out - ref)))
    print("KERNEL_OK")
</pallas_src>

<mosaic_0001>
module attributes {stable_mosaic.version = 11 : i64} {
  func.func @_block_kernel(%arg0: i32, %arg1: memref<8x32xf32, #tpu.memory_space<vmem>>, %arg2: memref<8x8xf32, #tpu.memory_space<vmem>>, %arg3: memref<1x32xf32, #tpu.memory_space<vmem>>, %arg4: memref<1x32xf32, #tpu.memory_space<vmem>>, %arg5: memref<4x32x8xbf16, #tpu.memory_space<vmem>>, %arg6: memref<4x32x8xbf16, #tpu.memory_space<vmem>>, %arg7: memref<4x32x8xbf16, #tpu.memory_space<vmem>>, %arg8: memref<4x8x32xbf16, #tpu.memory_space<vmem>>, %arg9: memref<1x32xf32, #tpu.memory_space<vmem>>, %arg10: memref<1x32xf32, #tpu.memory_space<vmem>>, %arg11: memref<1x32xf32, #tpu.memory_space<vmem>>, %arg12: memref<32x256xbf16, #tpu.memory_space<vmem>>, %arg13: memref<1x256xf32, #tpu.memory_space<vmem>>, %arg14: memref<128x32xbf16, #tpu.memory_space<vmem>>, %arg15: memref<1x32xf32, #tpu.memory_space<vmem>>, %arg16: memref<8x32xf32, #tpu.memory_space<vmem>>) attributes {dimension_semantics = [#tpu.dimension_semantics<parallel>], iteration_bounds = array<i64: 2>, scalar_prefetch = 0 : i64, scratch_operands = 0 : i64, tpu.core_type = #tpu.core_type<tc>, window_params = [{transform_indices = @transform_0, window_bounds = array<i64: 8, 32>}, {pipeline_mode = #tpu.pipeline_mode<synchronous>, transform_indices = @transform_1, window_bounds = array<i64: 8, 8>}, {pipeline_mode = #tpu.pipeline_mode<synchronous>, transform_indices = @transform_2, window_bounds = array<i64: 1, 32>}, {pipeline_mode = #tpu.pipeline_mode<synchronous>, transform_indices = @transform_3, window_bounds = array<i64: 1, 32>}, {pipeline_mode = #tpu.pipeline_mode<synchronous>, transform_indices = @transform_4, window_bounds = array<i64: 4, 32, 8>}, {pipeline_mode = #tpu.pipeline_mode<synchronous>, transform_indices = @transform_5, window_bounds = array<i64: 4, 32, 8>}, {pipeline_mode = #tpu.pipeline_mode<synchronous>, transform_indices = @transform_6, window_bounds = array<i64: 4, 32, 8>}, {pipeline_mode = #tpu.pipeline_mode<synchronous>, transform_indices = @transform_7, window_bounds = array<i64: 4, 8, 32>}, {pipeline_mode = #tpu.pipeline_mode<synchronous>, transform_indices = @transform_8, window_bounds = array<i64: 1, 32>}, {pipeline_mode = #tpu.pipeline_mode<synchronous>, transform_indices = @transform_9, window_bounds = array<i64: 1, 32>}, {pipeline_mode = #tpu.pipeline_mode<synchronous>, transform_indices = @transform_10, window_bounds = array<i64: 1, 32>}, {pipeline_mode = #tpu.pipeline_mode<synchronous>, transform_indices = @transform_11, window_bounds = array<i64: 32, 256>}, {pipeline_mode = #tpu.pipeline_mode<synchronous>, transform_indices = @transform_12, window_bounds = array<i64: 1, 256>}, {pipeline_mode = #tpu.pipeline_mode<synchronous>, transform_indices = @transform_13, window_bounds = array<i64: 128, 32>}, {pipeline_mode = #tpu.pipeline_mode<synchronous>, transform_indices = @transform_14, window_bounds = array<i64: 1, 32>}, {transform_indices = @transform_15, window_bounds = array<i64: 8, 32>}]} {
    %c0 = arith.constant 0 : index
    %c0_0 = arith.constant 0 : index
    %0 = vector.load %arg1[%c0, %c0_0] : memref<8x32xf32, #tpu.memory_space<vmem>>, vector<8x32xf32>
    %c0_1 = arith.constant 0 : index
    %c0_2 = arith.constant 0 : index
    %1 = vector.load %arg3[%c0_1, %c0_2] : memref<1x32xf32, #tpu.memory_space<vmem>>, vector<1x32xf32>
    %c0_3 = arith.constant 0 : index
    %c0_4 = arith.constant 0 : index
    %2 = vector.load %arg4[%c0_3, %c0_4] : memref<1x32xf32, #tpu.memory_space<vmem>>, vector<1x32xf32>
    %cst = arith.constant dense<0.000000e+00> : vector<8xf32>
    %3 = vector.multi_reduction <add>, %0, %cst [1] : vector<8x32xf32> to vector<8xf32>
    %4 = vector.shape_cast %3 : vector<8xf32> to vector<8x1xf32>
    %cst_5 = arith.constant 3.200000e+01 : f32
    %5 = vector.broadcast %cst_5 : f32 to vector<8x1xf32>
    %6 = arith.divf %4, %5 : vector<8x1xf32>
    %7 = vector.broadcast %6 : vector<8x1xf32> to vector<8x32xf32>
    %8 = arith.subf %0, %7 : vector<8x32xf32>
    %9 = arith.mulf %8, %8 : vector<8x32xf32>
    %cst_6 = arith.constant dense<0.000000e+00> : vector<8xf32>
    %10 = vector.multi_reduction <add>, %9, %cst_6 [1] : vector<8x32xf32> to vector<8xf32>
    %11 = vector.shape_cast %10 : vector<8xf32> to vector<8x1xf32>
    %cst_7 = arith.constant 3.200000e+01 : f32
    %12 = vector.broadcast %cst_7 : f32 to vector<8x1xf32>
    %13 = arith.divf %11, %12 : vector<8x1xf32>
    %14 = vector.broadcast %6 : vector<8x1xf32> to vector<8x32xf32>
    %15 = arith.subf %0, %14 : vector<8x32xf32>
    %cst_8 = arith.constant 9.99999974E-6 : f32
    %16 = vector.broadcast %cst_8 : f32 to vector<8x1xf32>
    %17 = arith.addf %13, %16 : vector<8x1xf32>
    %18 = math.rsqrt %17 : vector<8x1xf32>
    %19 = vector.broadcast %18 : vector<8x1xf32> to vector<8x32xf32>
    %20 = arith.mulf %15, %19 : vector<8x32xf32>
    %21 = vector.broadcast %1 : vector<1x32xf32> to vector<8x32xf32>
    %22 = arith.mulf %20, %21 : vector<8x32xf32>
    %23 = vector.broadcast %2 : vector<1x32xf32> to vector<8x32xf32>
    %24 = arith.addf %22, %23 : vector<8x32xf32>
    %25 = arith.truncf %24 : vector<8x32xf32> to vector<8x32xbf16>
    %26 = vector.shape_cast %25 : vector<8x32xbf16> to vector<1x8x32xbf16>
    %27 = vector.shape_cast %26 : vector<1x8x32xbf16> to vector<1x8x32xbf16>
    %28 = vector.broadcast %27 : vector<1x8x32xbf16> to vector<4x8x32xbf16>
    %c0_9 = arith.constant 0 : index
    %c0_10 = arith.constant 0 : index
    %c0_11 = arith.constant 0 : index
    %29 = vector.load %arg5[%c0_9, %c0_10, %c0_11] : memref<4x32x8xbf16, #tpu.memory_space<vmem>>, vector<4x32x8xbf16>
    %cst_12 = arith.constant dense<0.000000e+00> : vector<4x8x8xf32>
    %30 = tpu.matmul %28, %29, %cst_12 {dimension_numbers = #tpu.dot_dimension_numbers<[2], [1], [1], [2], [0, 0, 0, 1, 1, 2], [0], [0]>} : vector<4x8x32xbf16>, vector<4x32x8xbf16>, vector<4x8x8xf32> -> vector<4x8x8xf32>
    %c0_13 = arith.constant 0 : index
    %c0_14 = arith.constant 0 : index
    %c0_15 = arith.constant 0 : index
    %31 = vector.load %arg6[%c0_13, %c0_14, %c0_15] : memref<4x32x8xbf16, #tpu.memory_space<vmem>>, vector<4x32x8xbf16>
    %cst_16 = arith.constant dense<0.000000e+00> : vector<4x8x8xf32>
    %32 = tpu.matmul %28, %31, %cst_16 {dimension_numbers = #tpu.dot_dimension_numbers<[2], [1], [1], [2], [0, 0, 0, 1, 1, 2], [0], [0]>} : vector<4x8x32xbf16>, vector<4x32x8xbf16>, vector<4x8x8xf32> -> vector<4x8x8xf32>
    %c0_17 = arith.constant 0 : index
    %c0_18 = arith.constant 0 : index
    %c0_19 = arith.constant 0 : index
    %33 = vector.load %arg7[%c0_17, %c0_18, %c0_19] : memref<4x32x8xbf16, #tpu.memory_space<vmem>>, vector<4x32x8xbf16>
    %cst_20 = arith.constant dense<0.000000e+00> : vector<4x8x8xf32>
    %34 = tpu.matmul %28, %33, %cst_20 {dimension_numbers = #tpu.dot_dimension_numbers<[2], [1], [1], [2], [0, 0, 0, 1, 1, 2], [0], [0]>} : vector<4x8x32xbf16>, vector<4x32x8xbf16>, vector<4x8x8xf32> -> vector<4x8x8xf32>
    %35 = arith.truncf %30 : vector<4x8x8xf32> to vector<4x8x8xbf16>
    %36 = arith.truncf %32 : vector<4x8x8xf32> to vector<4x8x8xbf16>
    %cst_21 = arith.constant dense<0.000000e+00> : vector<4x8x8xf32>
    %37 = tpu.matmul %35, %36, %cst_21 {dimension_numbers = #tpu.dot_dimension_numbers<[2], [2], [1], [1], [0, 0, 0, 1, 1, 1], [0], [0]>} : vector<4x8x8xbf16>, vector<4x8x8xbf16>, vector<4x8x8xf32> -> vector<4x8x8xf32>
    %cst_22 = arith.constant dense<0xFF800000> : vector<4x8xf32>
    %38 = vector.multi_reduction <maximumf>, %37, %cst_22 [2] : vector<4x8x8xf32> to vector<4x8xf32>
    %39 = vector.shape_cast %38 : vector<4x8xf32> to vector<4x8x1xf32>
    %40 = vector.broadcast %39 : vector<4x8x1xf32> to vector<4x8x8xf32>
    %41 = arith.subf %37, %40 : vector<4x8x8xf32>
    %42 = math.exp %41 : vector<4x8x8xf32>
    %cst_23 = arith.constant dense<0.000000e+00> : vector<4x8xf32>
    %43 = vector.multi_reduction <add>, %42, %cst_23 [2] : vector<4x8x8xf32> to vector<4x8xf32>
    %44 = vector.shape_cast %43 : vector<4x8xf32> to vector<4x8x1xf32>
    %45 = tpu.reciprocal %44 {approx = true} : vector<4x8x1xf32> -> vector<4x8x1xf32>
    %46 = vector.broadcast %45 : vector<4x8x1xf32> to vector<4x8x8xf32>
    %47 = arith.mulf %42, %46 : vector<4x8x8xf32>
    %48 = arith.truncf %47 : vector<4x8x8xf32> to vector<4x8x8xbf16>
    %49 = arith.truncf %34 : vector<4x8x8xf32> to vector<4x8x8xbf16>
    %cst_24 = arith.constant dense<0.000000e+00> : vector<4x8x8xf32>
    %50 = tpu.matmul %48, %49, %cst_24 {dimension_numbers = #tpu.dot_dimension_numbers<[2], [1], [1], [2], [0, 0, 0, 1, 1, 2], [0], [0]>} : vector<4x8x8xbf16>, vector<4x8x8xbf16>, vector<4x8x8xf32> -> vector<4x8x8xf32>
    %51 = arith.truncf %50 : vector<4x8x8xf32> to vector<4x8x8xbf16>
    %c0_25 = arith.constant 0 : index
    %c0_26 = arith.constant 0 : index
    %c0_27 = arith.constant 0 : index
    %52 = vector.load %arg8[%c0_25, %c0_26, %c0_27] : memref<4x8x32xbf16, #tpu.memory_space<vmem>>, vector<4x8x32xbf16>
    %cst_28 = arith.constant dense<0.000000e+00> : vector<4x8x32xf32>
    %53 = tpu.matmul %51, %52, %cst_28 {dimension_numbers = #tpu.dot_dimension_numbers<[2], [1], [1], [2], [0, 0, 0, 1, 1, 2], [0], [0]>} : vector<4x8x8xbf16>, vector<4x8x32xbf16>, vector<4x8x32xf32> -> vector<4x8x32xf32>
    %cst_29 = arith.constant dense<0.000000e+00> : vector<8x32xf32>
    %54 = vector.multi_reduction <add>, %53, %cst_29 [0] : vector<4x8x32xf32> to vector<8x32xf32>
    %c0_30 = arith.constant 0 : index
    %c0_31 = arith.constant 0 : index
    %55 = vector.load %arg9[%c0_30, %c0_31] : memref<1x32xf32, #tpu.memory_space<vmem>>, vector<1x32xf32>
    %56 = vector.broadcast %55 : vector<1x32xf32> to vector<8x32xf32>
    %57 = arith.addf %54, %56 : vector<8x32xf32>
    %58 = arith.addf %57, %0 : vector<8x32xf32>
    %c0_32 = arith.constant 0 : index
    %c0_33 = arith.constant 0 : index
    %59 = vector.load %arg10[%c0_32, %c0_33] : memref<1x32xf32, #tpu.memory_space<vmem>>, vector<1x32xf32>
    %c0_34 = arith.constant 0 : index
    %c0_35 = arith.constant 0 : index
    %60 = vector.load %arg11[%c0_34, %c0_35] : memref<1x32xf32, #tpu.memory_space<vmem>>, vector<1x32xf32>
    %cst_36 = arith.constant dense<0.000000e+00> : vector<8xf32>
    %61 = vector.multi_reduction <add>, %58, %cst_36 [1] : vector<8x32xf32> to vector<8xf32>
    %62 = vector.shape_cast %61 : vector<8xf32> to vector<8x1xf32>
    %cst_37 = arith.constant 3.200000e+01 : f32
    %63 = vector.broadcast %cst_37 : f32 to vector<8x1xf32>
    %64 = arith.divf %62, %63 : vector<8x1xf32>
    %65 = vector.broadcast %64 : vector<8x1xf32> to vector<8x32xf32>
    %66 = arith.subf %58, %65 : vector<8x32xf32>
    %67 = arith.mulf %66, %66 : vector<8x32xf32>
    %cst_38 = arith.constant dense<0.000000e+00> : vector<8xf32>
    %68 = vector.multi_reduction <add>, %67, %cst_38 [1] : vector<8x32xf32> to vector<8xf32>
    %69 = vector.shape_cast %68 : vector<8xf32> to vector<8x1xf32>
    %cst_39 = arith.constant 3.200000e+01 : f32
    %70 = vector.broadcast %cst_39 : f32 to vector<8x1xf32>
    %71 = arith.divf %69, %70 : vector<8x1xf32>
    %72 = vector.broadcast %64 : vector<8x1xf32> to vector<8x32xf32>
    %73 = arith.subf %58, %72 : vector<8x32xf32>
    %cst_40 = arith.constant 9.99999974E-6 : f32
    %74 = vector.broadcast %cst_40 : f32 to vector<8x1xf32>
    %75 = arith.addf %71, %74 : vector<8x1xf32>
    %76 = math.rsqrt %75 : vector<8x1xf32>
    %77 = vector.broadcast %76 : vector<8x1xf32> to vector<8x32xf32>
    %78 = arith.mulf %73, %77 : vector<8x32xf32>
    %79 = vector.broadcast %59 : vector<1x32xf32> to vector<8x32xf32>
    %80 = arith.mulf %78, %79 : vector<8x32xf32>
    %81 = vector.broadcast %60 : vector<1x32xf32> to vector<8x32xf32>
    %82 = arith.addf %80, %81 : vector<8x32xf32>
    %83 = arith.truncf %82 : vector<8x32xf32> to vector<8x32xbf16>
    %c0_41 = arith.constant 0 : index
    %c0_42 = arith.constant 0 : index
    %84 = vector.load %arg12[%c0_41, %c0_42] : memref<32x256xbf16, #tpu.memory_space<vmem>>, vector<32x256xbf16>
    %cst_43 = arith.constant dense<0.000000e+00> : vector<8x256xf32>
    %85 = tpu.matmul %83, %84, %cst_43 {dimension_numbers = #tpu.dot_dimension_numbers<[1], [0], [0], [1], [0, 0, 1, 1], [], []>} : vector<8x32xbf16>, vector<32x256xbf16>, vector<8x256xf32> -> vector<8x256xf32>
    %c0_44 = arith.constant 0 : index
    %c0_45 = arith.constant 0 : index
    %86 = vector.load %arg13[%c0_44, %c0_45] : memref<1x256xf32, #tpu.memory_space<vmem>>, vector<1x256xf32>
    %87 = vector.broadcast %86 : vector<1x256xf32> to vector<8x256xf32>
    %88 = arith.addf %85, %87 : vector<8x256xf32>
    %89 = vector.extract_strided_slice %88 {offsets = [0, 0], sizes = [8, 128], strides = [1, 1]} : vector<8x256xf32> to vector<8x128xf32>
    %90 = vector.extract_strided_slice %88 {offsets = [0, 128], sizes = [8, 128], strides = [1, 1]} : vector<8x256xf32> to vector<8x128xf32>
    %cst_46 = arith.constant 5.000000e-01 : f32
    %91 = vector.broadcast %cst_46 : f32 to vector<8x128xf32>
    %92 = arith.mulf %91, %90 : vector<8x128xf32>
    %cst_47 = arith.constant 0.707106769 : f32
    %93 = vector.broadcast %cst_47 : f32 to vector<8x128xf32>
    %94 = arith.mulf %90, %93 : vector<8x128xf32>
    %cst_48 = arith.constant 0.000000e+00 : f32
    %95 = vector.broadcast %cst_48 : f32 to vector<8x128xf32>
    %96 = arith.cmpf oge, %94, %95 : vector<8x128xf32>
    %cst_49 = arith.constant 1.000000e+00 : f32
    %cst_50 = arith.constant -1.000000e+00 : f32
    %97 = vector.broadcast %cst_49 : f32 to vector<8x128xf32>
    %98 = vector.broadcast %cst_50 : f32 to vector<8x128xf32>
    %99 = arith.select %96, %97, %98 : vector<8x128xi1>, vector<8x128xf32>
    %100 = math.absf %94 : vector<8x128xf32>
    %cst_51 = arith.constant 0.327591091 : f32
    %101 = vector.broadcast %cst_51 : f32 to vector<8x128xf32>
    %102 = arith.mulf %101, %100 : vector<8x128xf32>
    %cst_52 = arith.constant 1.000000e+00 : f32
    %103 = vector.broadcast %cst_52 : f32 to vector<8x128xf32>
    %104 = arith.addf %103, %102 : vector<8x128xf32>
    %105 = tpu.reciprocal %104 {approx = true} : vector<8x128xf32> -> vector<8x128xf32>
    %cst_53 = arith.constant 1.06140542 : f32
    %106 = vector.broadcast %cst_53 : f32 to vector<8x128xf32>
    %107 = arith.mulf %106, %105 : vector<8x128xf32>
    %cst_54 = arith.constant -1.45315206 : f32
    %108 = vector.broadcast %cst_54 : f32 to vector<8x128xf32>
    %109 = arith.addf %107, %108 : vector<8x128xf32>
    %110 = arith.mulf %109, %105 : vector<8x128xf32>
    %cst_55 = arith.constant 1.42141378 : f32
    %111 = vector.broadcast %cst_55 : f32 to vector<8x128xf32>
    %112 = arith.addf %110, %111 : vector<8x128xf32>
    %113 = arith.mulf %112, %105 : vector<8x128xf32>
    %cst_56 = arith.constant -0.284496725 : f32
    %114 = vector.broadcast %cst_56 : f32 to vector<8x128xf32>
    %115 = arith.addf %113, %114 : vector<8x128xf32>
    %116 = arith.mulf %115, %105 : vector<8x128xf32>
    %cst_57 = arith.constant 0.254829586 : f32
    %117 = vector.broadcast %cst_57 : f32 to vector<8x128xf32>
    %118 = arith.addf %116, %117 : vector<8x128xf32>
    %119 = arith.mulf %118, %105 : vector<8x128xf32>
    %cst_58 = arith.constant 0.000000e+00 : f32
    %120 = vector.broadcast %cst_58 : f32 to vector<8x128xf32>
    %121 = arith.subf %120, %100 : vector<8x128xf32>
    %122 = arith.mulf %121, %100 : vector<8x128xf32>
    %123 = math.exp %122 : vector<8x128xf32>
    %124 = arith.mulf %119, %123 : vector<8x128xf32>
    %cst_59 = arith.constant 1.000000e+00 : f32
    %125 = vector.broadcast %cst_59 : f32 to vector<8x128xf32>
    %126 = arith.subf %125, %124 : vector<8x128xf32>
    %127 = arith.mulf %99, %126 : vector<8x128xf32>
    %cst_60 = arith.constant 1.000000e+00 : f32
    %128 = vector.broadcast %cst_60 : f32 to vector<8x128xf32>
    %129 = arith.addf %128, %127 : vector<8x128xf32>
    %130 = arith.mulf %92, %129 : vector<8x128xf32>
    %131 = arith.mulf %89, %130 : vector<8x128xf32>
    %132 = arith.truncf %131 : vector<8x128xf32> to vector<8x128xbf16>
    %c0_61 = arith.constant 0 : index
    %c0_62 = arith.constant 0 : index
    %133 = vector.load %arg14[%c0_61, %c0_62] : memref<128x32xbf16, #tpu.memory_space<vmem>>, vector<128x32xbf16>
    %cst_63 = arith.constant dense<0.000000e+00> : vector<8x32xf32>
    %134 = tpu.matmul %132, %133, %cst_63 {dimension_numbers = #tpu.dot_dimension_numbers<[1], [0], [0], [1], [0, 0, 1, 1], [], []>} : vector<8x128xbf16>, vector<128x32xbf16>, vector<8x32xf32> -> vector<8x32xf32>
    %c0_64 = arith.constant 0 : index
    %c0_65 = arith.constant 0 : index
    %135 = vector.load %arg15[%c0_64, %c0_65] : memref<1x32xf32, #tpu.memory_space<vmem>>, vector<1x32xf32>
    %136 = vector.broadcast %135 : vector<1x32xf32> to vector<8x32xf32>
    %137 = arith.addf %134, %136 : vector<8x32xf32>
    %138 = arith.addf %58, %137 : vector<8x32xf32>
    %c0_66 = arith.constant 0 : index
    %c0_67 = arith.constant 0 : index
    %139 = vector.load %arg16[%c0_66, %c0_67] : memref<8x32xf32, #tpu.memory_space<vmem>>, vector<8x32xf32>
    tpu.vector_store %arg16[%c0_66, %c0_67], %138 {strides = array<i32>} : memref<8x32xf32, #tpu.memory_space<vmem>>, vector<8x32xf32>,
    return
  }
  func.func @transform_0(%arg0: i32) -> (i32, i32) {
    %c0_i32 = arith.constant 0 : i32
    %c0_i32_0 = arith.constant 0 : i32
    return %arg0, %c0_i32 : i32, i32
  }
  func.func @transform_1(%arg0: i32) -> (i32, i32) {
    %c0_i32 = arith.constant 0 : i32
    %c0_i32_0 = arith.constant 0 : i32
    %c0_i32_1 = arith.constant 0 : i32
    return %c0_i32, %c0_i32_0 : i32, i32
  }
  func.func @transform_2(%arg0: i32) -> (i32, i32) {
    %c0_i32 = arith.constant 0 : i32
    %c0_i32_0 = arith.constant 0 : i32
    %c0_i32_1 = arith.constant 0 : i32
    return %c0_i32, %c0_i32_0 : i32, i32
  }
  func.func @transform_3(%arg0: i32) -> (i32, i32) {
    %c0_i32 = arith.constant 0 : i32
    %c0_i32_0 = arith.constant 0 : i32
    %c0_i32_1 = arith.constant 0 : i32
    return %c0_i32, %c0_i32_0 : i32, i32
  }
  func.func @transform_4(%arg0: i32) -> (i32, i32, i32) {
    %c0_i32 = arith.constant 0 : i32
    %c0_i32_0 = arith.constant 0 : i32
    %c0_i32_1 = arith.constant 0 : i32
    %c0_i32_2 = arith.constant 0 : i32
    return %c0_i32, %c0_i32_0, %c0_i32_1 : i32, i32, i32
  }
  func.func @transform_5(%arg0: i32) -> (i32, i32, i32) {
    %c0_i32 = arith.constant 0 : i32
    %c0_i32_0 = arith.constant 0 : i32
    %c0_i32_1 = arith.constant 0 : i32
    %c0_i32_2 = arith.constant 0 : i32
    return %c0_i32, %c0_i32_0, %c0_i32_1 : i32, i32, i32
  }
  func.func @transform_6(%arg0: i32) -> (i32, i32, i32) {
    %c0_i32 = arith.constant 0 : i32
    %c0_i32_0 = arith.constant 0 : i32
    %c0_i32_1 = arith.constant 0 : i32
    %c0_i32_2 = arith.constant 0 : i32
    return %c0_i32, %c0_i32_0, %c0_i32_1 : i32, i32, i32
  }
  func.func @transform_7(%arg0: i32) -> (i32, i32, i32) {
    %c0_i32 = arith.constant 0 : i32
    %c0_i32_0 = arith.constant 0 : i32
    %c0_i32_1 = arith.constant 0 : i32
    %c0_i32_2 = arith.constant 0 : i32
    return %c0_i32, %c0_i32_0, %c0_i32_1 : i32, i32, i32
  }
  func.func @transform_8(%arg0: i32) -> (i32, i32) {
    %c0_i32 = arith.constant 0 : i32
    %c0_i32_0 = arith.constant 0 : i32
    %c0_i32_1 = arith.constant 0 : i32
    return %c0_i32, %c0_i32_0 : i32, i32
  }
  func.func @transform_9(%arg0: i32) -> (i32, i32) {
    %c0_i32 = arith.constant 0 : i32
    %c0_i32_0 = arith.constant 0 : i32
    %c0_i32_1 = arith.constant 0 : i32
    return %c0_i32, %c0_i32_0 : i32, i32
  }
  func.func @transform_10(%arg0: i32) -> (i32, i32) {
    %c0_i32 = arith.constant 0 : i32
    %c0_i32_0 = arith.constant 0 : i32
    %c0_i32_1 = arith.constant 0 : i32
    return %c0_i32, %c0_i32_0 : i32, i32
  }
  func.func @transform_11(%arg0: i32) -> (i32, i32) {
    %c0_i32 = arith.constant 0 : i32
    %c0_i32_0 = arith.constant 0 : i32
    %c0_i32_1 = arith.constant 0 : i32
    return %c0_i32, %c0_i32_0 : i32, i32
  }
  func.func @transform_12(%arg0: i32) -> (i32, i32) {
    %c0_i32 = arith.constant 0 : i32
    %c0_i32_0 = arith.constant 0 : i32
    %c0_i32_1 = arith.constant 0 : i32
    return %c0_i32, %c0_i32_0 : i32, i32
  }
  func.func @transform_13(%arg0: i32) -> (i32, i32) {
    %c0_i32 = arith.constant 0 : i32
    %c0_i32_0 = arith.constant 0 : i32
    %c0_i32_1 = arith.constant 0 : i32
    return %c0_i32, %c0_i32_0 : i32, i32
  }
  func.func @transform_14(%arg0: i32) -> (i32, i32) {
    %c0_i32 = arith.constant 0 : i32
    %c0_i32_0 = arith.constant 0 : i32
    %c0_i32_1 = arith.constant 0 : i32
    return %c0_i32, %c0_i32_0 : i32, i32
  }
  func.func @transform_15(%arg0: i32) -> (i32, i32) {
    %c0_i32 = arith.constant 0 : i32
    %c0_i32_0 = arith.constant 0 : i32
    return %arg0, %c0_i32 : i32, i32
  }
}

</mosaic_0001>

<bundles_post_ra>
// kernel: basic_transformer_block.1
= control target key start
LH: loop header
LB: loop body
LE: loop exit
PB: predicated region body
PF: predicated region fallthrough
CT: control target
= control target key end

     0   :  { %s3171_s0 = inlined_call_operand.vmem [shape: f32[16,32], index: 0, kind: input, shape index: {}]   ;;  %s3172_s1 = inlined_call_operand.vmem [shape: f32[8,8], index: 1, kind: input, shape index: {}]   ;;  %s3173_s2 = inlined_call_operand.vmem [shape: f32[1,32], index: 2, kind: input, shape index: {}]   ;;  %s3174_s3 = inlined_call_operand.vmem [shape: f32[1,32], index: 3, kind: input, shape index: {}]   ;;  %s3175_s4 = inlined_call_operand.vmem [shape: bf16[4,32,8], index: 4, kind: input, shape index: {}]   ;;  %s3176_s5 = inlined_call_operand.vmem [shape: bf16[4,32,8], index: 5, kind: input, shape index: {}]   ;;  %s3177_s6 = inlined_call_operand.vmem [shape: bf16[4,32,8], index: 6, kind: input, shape index: {}]   ;;  %s3178_s7 = inlined_call_operand.vmem [shape: bf16[4,8,32], index: 7, kind: input, shape index: {}]   ;;  %s3179_s8 = inlined_call_operand.vmem [shape: f32[1,32], index: 8, kind: input, shape index: {}]   ;;  %s3180_s9 = inlined_call_operand.vmem [shape: f32[1,32], index: 9, kind: input, shape index: {}]   ;;  %s3181_s10 = inlined_call_operand.vmem [shape: f32[1,32], index: 10, kind: input, shape index: {}]   ;;  %s3182_s11 = inlined_call_operand.vmem [shape: bf16[32,256], index: 11, kind: input, shape index: {}]   ;;  %s3183_s12 = inlined_call_operand.vmem [shape: f32[1,256], index: 12, kind: input, shape index: {}]   ;;  %s3184_s13 = inlined_call_operand.vmem [shape: bf16[128,32], index: 13, kind: input, shape index: {}]   ;;  %s3185_s14 = inlined_call_operand.vmem [shape: f32[1,32], index: 14, kind: input, shape index: {}]   ;;  %s3186_s15 = inlined_call_operand.hbm [shape: f32[16,32], index: 15, kind: output, shape index: {}]  }
   0x1   :  { %3187 = sst [smem:[#allocation5_spill]] %s3171_s0 }
   0x2   :  { %3188 = sst [smem:[#allocation6_spill]] %s3173_s2 }
   0x3   :  { %3189 = sst [smem:[#allocation7_spill]] %s3174_s3 }
   0x4   :  { %3190 = sst [smem:[#allocation8_spill]] %s3175_s4 }
   0x5   :  { %20 = vsyncpa [#allocation3], 0 }
   0x6   :  { %22 = vsyncpa [#allocation3 + $0x1], 0  ;;  %s2747_s17 = smov 0   ;;  %s2749_s1 = smov 0  }
   0x7   :  { %s2751_s18 = smov 0   ;;  %s2753_s19 = smov 0  }
   0x8 LB: > { %s2768_s20 = sadd.s32 4294967295, %s2660_s19   ;;  %s2161_s21 = sadd.s32 4294967294, %s2660_s19   ;;  %s2660_s19 = sphi %s2753_s19, %s3200_s19   ;;  %s2656_s18 = sphi %s2751_s18, %s3199_s18   ;;  %s2652_s1 = sphi %s2749_s1, %s3198_s1   ;;  %s2648_s17 = sphi %s2747_s17, %s3197_s17  }
   0x9   : > { %s2772_s22 = sadd.s32 1, %s2660_s19   ;;  %s355_s23 = sadd.s32 1, %s2656_s18 }
   0xa   : > { %s352_s24 = ssub.s32 %s2660_s19, %s2772_s22  ;;  %p365_p0 = scmp.ne.s32.totalorder %s2656_s18, %s2652_s1 }
   0xb   : > { %p353_p1 = scmp.eq.s32.totalorder %s352_s24, 0  ;;  %p366_p2 = scmp.eq.s32.totalorder %s2768_s20, 1 }
   0xc   : > { %p371_p3 = scmp.ne.s32.totalorder %s2652_s1, %s2648_s17  ;;  %p372_p4 = scmp.eq.s32.totalorder %s2161_s21, 1 }
   0xd   : > { %s2783_s25 = scalar_select %p353_p1, %s2656_s18, %s355_s23  }
   0xe   : > { %p2785_p5 = por %p366_p2, %p365_p0  ;;  %p2789_p6 = por %p372_p4, %p371_p3 }
   0xf   : > { %p2164_p7 = scmp.ge.s32.totalorder %s2660_s19, 1  ;;  %p439_p8 = scmp.lt.s32.totalorder %s2660_s19, 3 }
  0x11   : > { %p440_p9 = pnand %p2164_p7, %p439_p8 }
  0x12   : > { %p486_p10 = scmp.lt.s32.totalorder (!%p440_p9), %s2768_s20, 1  ;;  %s3193_s0 = sld [smem:[#allocation5_spill]] (!%p440_p9) }
  0x13   : > { %443 = sbr.rel (%p440_p9) target bundleno = 2252 (0x8cc), region = 80  ;;  %s3194_s4 = sld [smem:[#allocation8_spill]] (!%p440_p9) }
  0x14   : > { %s3195_s2 = sld [smem:[#allocation6_spill]] (!%p440_p9)  ;;  %s2235_s24 = sshll.u32 (!%p440_p9), %s2768_s20, 7 }
  0x15   : > { %s3196_s3 = sld [smem:[#allocation7_spill]] (!%p440_p9) }
  0x18   : > { %vm494_vm0 = vcmask 261120   ;;  %s487_s28 = scalar_select %p486_p10, %s2768_s20, 1  ;;  %v2662_v9 = vmov 0.0   ;;  %vm2663_vm1 = vmmov 0   ;;  %v2543_v22 = vld [vmem:[%s3176_s5 + $0x18] sm:$0xff]   ;;  %v2545_v25 = vld [vmem:[%s3176_s5 + $0x10] sm:$0xff]  }
  0x19   : > { %v2538_v7 = vld [vmem:[%s3194_s4 + $0x8] sm:$0xff]   ;;  %v2539_v8 = vld [vmem:[%s3194_s4 + $0x38] sm:$0xff]   ;;  %2307 = vmatprep.subr.bf16.mxu0 %v2662_v9  ;;  %2331 = vmatprep.subr.bf16.mxu1 %v2662_v9  ;;  %v2540_v10 = vld [vmem:[%s3194_s4] sm:$0xff]   ;;  %vm1207_vm2 = vcmask 64512   ;;  %vm1447_vm3 = vcmask 1043456  }
  0x1a   : > { %s2166_s29 = sshll.u32 %s487_s28, 3  ;;  %2308 = vmatpush3.bf16.msra.mxu0 %v2538_v7  ;;  %2332 = vmatpush3.bf16.msra.mxu1 %v2539_v8  ;;  %v2541_v11 = vld [vmem:[%s3194_s4 + $0x30] sm:$0xff]   ;;  %v2167_v16 = vld [vmem:[%s3195_s2] ss:$0 sm:$0xff]  ;;  %v2542_v21 = vld [vmem:[%s3194_s4 + $0x18] sm:$0xff]  }
  0x1b   : > { %s489_s21 = scalar_lea.vmem %s3193_s0, %s2166_s29  ;;  %2309 = vmatprep.subr.bf16.mxu0 %v2662_v9  ;;  %2333 = vmatprep.subr.bf16.mxu1 %v2662_v9  ;;  %v2168_v18 = vld [vmem:[%s3196_s3] ss:$0 sm:$0xff]  ;;  %v2544_v24 = vld [vmem:[%s3194_s4 + $0x10] sm:$0xff]   ;;  %v2546_v26 = vld [vmem:[%s3194_s4 + $0x28] sm:$0xff]   ;;  %s483_s0 = sand.u32 1, %s2652_s1  }
  0x1c   : > { %v2800_v0 = vld [vmem:[%s489_s21] sm:$0xff]  ;;  %2311 = vmatprep.mubr.msk.bf16.mxu0 %vm2663_vm1, %v2662_v9  ;;  %2335 = vmatprep.mubr.msk.bf16.mxu1 %vm2663_vm1, %v2662_v9  ;;  %v2547_v27 = vld [vmem:[%s3176_s5 + $0x38] sm:$0xff]   ;;  %v2549_v29 = vld [vmem:[%s3176_s5 + $0x30] sm:$0xff]   ;;  %s2165_s16 = sshll.u32 %s483_s0, 3  ;;  %s3129_s3 = scalar_lea.hbm %s3186_s15, %s2235_s24 }
  0x1d   : > { %v495_v1 = vsel %vm494_vm0, %v2800_v0, 0.0  ;;  %v2548_v28 = vld [vmem:[%s3194_s4 + $0x20] sm:$0xff]   ;;  %v2550_v30 = vld [vmem:[%s3176_s5 + $0x8] sm:$0xff]   ;;  %v2551_v31 = vld [vmem:[%s3177_s6 + $0x18] sm:$0xff]   ;;  %s485_s28 = scalar_lea.vmem [#allocation2], %s2165_s16  ;;  %s2089_s20 = scalar_lea.sflag [#allocation3], %s483_s0 }
  0x1e   : > { %496 = vadd.xlane.f32.xlu0 %v495_v1  ;;  %2310 = vmatpush3.bf16.msra.mxu0 %v2540_v10  ;;  %v2552_v32 = vld [vmem:[%s3176_s5] sm:$0xff]   ;;  %v2553_v33 = vld [vmem:[%s3177_s6 + $0x10] sm:$0xff]   ;;  %v2554_v34 = vld [vmem:[%s3176_s5 + $0x28] sm:$0xff]   ;;  %s2102_s29 = sshll.u32 %s485_s28, 4  ;;  %s2666_s21 = smov [#allocation2]   ;;  %s3131_s29 = int_to_ptr.vmem [resolvable:$true] %s2102_s29 }
  0x1f   : > { %2334 = vmatpush3.bf16.msra.mxu1 %v2541_v11  ;;  %2315 = vmatprep.subr.bf16.mxu0 %v2662_v9  ;;  %v2555_v35 = vld [vmem:[%s3177_s6 + $0x38] sm:$0xff]   ;;  %v2556_v36 = vld [vmem:[%s3176_s5 + $0x20] sm:$0xff]   ;;  %v2557_v37 = vld [vmem:[%s3177_s6 + $0x30] sm:$0xff]   ;;  %s2600_s16 = scalar_lea.vmem %s3131_s29, 128  ;;  %s2604_s23 = sshll.u32 %s2666_s21, 4  ;;  %s2605_s23 = int_to_ptr.vmem [resolvable:$false] %s2604_s23 }
  0x20   : > { %2347 = vmatprep.subr.bf16.mxu1 %v2662_v9  ;;  %v2558_v38 = vld [vmem:[%s3177_s6 + $0x8] sm:$0xff]   ;;  %v2559_v39 = vld [vmem:[%s3177_s6] sm:$0xff]   ;;  %p2601_p11 = scmp.ne.s32.totalorder %s3131_s29, %s2600_s16  ;;  %s2606_s2 = scalar_lea.vmem %s2605_s23, 256 }
  0x21   : > { %v2560_v40 = vld [vmem:[%s3177_s6 + $0x28] sm:$0xff]   ;;  %v2561_v41 = vld [vmem:[%s3177_s6 + $0x20] sm:$0xff]   ;;  %p2607_p0 = scmp.lt.s32.totalorder %s3131_s29, %s2605_s23  ;;  %p2608_p1 = scmp.lt.s32.totalorder %s2606_s2, %s2600_s16 }
  0x22   : > { %p2602_p12 = pnand %p2601_p11, %p2785_p5 }
  0x23   : > { %p2609_p2 = por %p2608_p1, %p2607_p0 }
  0x24   : > { %p2603_p13 = pneg %p2602_p12 }
  0x26   : > { %p2610_p3 = pnand %p2609_p2, %p2603_p13 }
  0xa7   : > { %v497_v2 = vpop.xlane.xlu0 %496 }
  0xa8   : > { %v499_v3 = vmul.f32 0.03125, %v497_v2 }
  0xaa   : > { %v500_v4 = vsub.f32 %v2800_v0, %v499_v3 }
  0xac   : > { %v501_v5 = vmul.f32 %v500_v4, %v500_v4 }
  0xae   : > { %v502_v6 = vsel %vm494_vm0, %v501_v5, 0.0 }
  0xaf   : > { %503 = vadd.xlane.f32.xlu0 %v502_v6 }
 0x138   : > { %v504_v12 = vpop.xlane.xlu0 %503 }
 0x139   : > { %v505_v13 = vmul.f32 0.03125, %v504_v12 }
 0x13b   : > { %v506_v14 = vadd.f32 1e-05, %v505_v13 }
 0x13d   : > { %2576 = vrsqrt.f32 %v506_v14 }
 0x14a   : > { %v2577_v15 = vpop.eup %2576 }
 0x14b   : > { %v508_v17 = vmul.f32 %v2577_v15, %v500_v4 }
 0x14d   : > { %v515_v19 = vmul.f32 %v2167_v16, %v508_v17 }
 0x14f   : > { %v522_v20 = vadd.f32 %v2168_v18, %v515_v19 }
 0x151   : > { %v2840_v23 = vpack.c.bf16 %v522_v20, %v522_v20 }
 0x153   : > { %2312 = vmatmul.mubr.msk.bf16.vlgmr.msra.gmra.mxu0 %vm494_vm0, %v2840_v23  ;;  %2336 = vmatmul.mubr.msk.bf16.vlgmr.msra.gmra.mxu1 %vm494_vm0, %v2840_v23 }
 0x154   : > { %2316 = vmatpush3.bf16.msra.mxu0 %v2542_v21  ;;  %2348 = vmatpush3.bf16.msra.mxu1 %v2543_v22 }
 0x155   : > { %2317 = vmatprep.subr.bf16.mxu0 %v2662_v9  ;;  %2349 = vmatprep.subr.bf16.mxu1 %v2662_v9 }
 0x156   : > { %2319 = vmatprep.mubr.msk.bf16.mxu0 %vm2663_vm1, %v2662_v9  ;;  %2351 = vmatprep.mubr.msk.bf16.mxu1 %vm2663_vm1, %v2662_v9 }
 0x158   : > { %2318 = vmatpush3.bf16.msra.mxu0 %v2544_v24  ;;  %2350 = vmatpush3.bf16.msra.mxu1 %v2545_v25 }
 0x159   : > { %2323 = vmatprep.subr.bf16.mxu0 %v2662_v9  ;;  %2363 = vmatprep.subr.bf16.mxu1 %v2662_v9 }
 0x15b   : > { %2320 = vmatmul.mubr.msk.bf16.vlgmr.msra.gmra.mxu0 %vm494_vm0, %v2840_v23  ;;  %2352 = vmatmul.mubr.msk.bf16.vlgmr.msra.gmra.mxu1 %vm494_vm0, %v2840_v23 }
 0x15c   : > { %2324 = vmatpush3.bf16.msra.mxu0 %v2546_v26  ;;  %2364 = vmatpush3.bf16.msra.mxu1 %v2547_v27 }
 0x15d   : > { %2325 = vmatprep.subr.bf16.mxu0 %v2662_v9  ;;  %2365 = vmatprep.subr.bf16.mxu1 %v2662_v9 }
 0x15e   : > { %2327 = vmatprep.mubr.msk.bf16.mxu0 %vm2663_vm1, %v2662_v9  ;;  %2367 = vmatprep.mubr.msk.bf16.mxu1 %vm2663_vm1, %v2662_v9 }
 0x160   : > { %2326 = vmatpush3.bf16.msra.mxu0 %v2548_v28  ;;  %2366 = vmatpush3.bf16.msra.mxu1 %v2549_v29 }
 0x161   : > { %2339 = vmatprep.subr.bf16.mxu0 %v2662_v9  ;;  %2379 = vmatprep.subr.bf16.mxu1 %v2662_v9 }
 0x163   : > { %2328 = vmatmul.mubr.msk.bf16.vlgmr.msra.gmra.mxu0 %vm494_vm0, %v2840_v23  ;;  %2368 = vmatmul.mubr.msk.bf16.vlgmr.msra.gmra.mxu1 %vm494_vm0, %v2840_v23 }
 0x164   : > { %2340 = vmatpush3.bf16.msra.mxu0 %v2550_v30  ;;  %2380 = vmatpush3.bf16.msra.mxu1 %v2551_v31 }
 0x165   : > { %2341 = vmatprep.subr.bf16.mxu0 %v2662_v9  ;;  %2381 = vmatprep.subr.bf16.mxu1 %v2662_v9 }
 0x166   : > { %2343 = vmatprep.mubr.msk.bf16.mxu0 %vm2663_vm1, %v2662_v9  ;;  %2383 = vmatprep.mubr.msk.bf16.mxu1 %vm2663_vm1, %v2662_v9 }
 0x168   : > { %2342 = vmatpush3.bf16.msra.mxu0 %v2552_v32  ;;  %2382 = vmatpush3.bf16.msra.mxu1 %v2553_v33 }
 0x169   : > { %2355 = vmatprep.subr.bf16.mxu0 %v2662_v9  ;;  %2395 = vmatprep.subr.bf16.mxu1 %v2662_v9 }
 0x16b   : > { %2344 = vmatmul.mubr.msk.bf16.vlgmr.msra.gmra.mxu0 %vm494_vm0, %v2840_v23  ;;  %2384 = vmatmul.mubr.msk.bf16.vlgmr.msra.gmra.mxu1 %vm494_vm0, %v2840_v23 }
 0x16c   : > { %2356 = vmatpush3.bf16.msra.mxu0 %v2554_v34  ;;  %2396 = vmatpush3.bf16.msra.mxu1 %v2555_v35 }
 0x16d   : > { %2357 = vmatprep.subr.bf16.mxu0 %v2662_v9  ;;  %2397 = vmatprep.subr.bf16.mxu1 %v2662_v9 }
 0x16e   : > { %2359 = vmatprep.mubr.msk.bf16.mxu0 %vm2663_vm1, %v2662_v9  ;;  %2399 = vmatprep.mubr.msk.bf16.mxu1 %vm2663_vm1, %v2662_v9 }
 0x170   : > { %2358 = vmatpush3.bf16.msra.mxu0 %v2556_v36  ;;  %2398 = vmatpush3.bf16.msra.mxu1 %v2557_v37 }
 0x171   : > { %2371 = vmatprep.subr.bf16.mxu0 %v2662_v9  ;;  %2409 = vmatprep.subr.bf16.mxu1 %v2662_v9 }
 0x173   : > { %2360 = vmatmul.mubr.msk.bf16.vlgmr.msra.gmra.mxu0 %vm494_vm0, %v2840_v23  ;;  %2400 = vmatmul.mubr.msk.bf16.vlgmr.msra.gmra.mxu1 %vm494_vm0, %v2840_v23 }
 0x174   : > { %2372 = vmatpush3.bf16.msra.mxu0 %v2558_v38  ;;  %2375 = vmatprep.mubr.msk.bf16.mxu0 %vm2663_vm1, %v2662_v9 }
 0x175   : > { %2373 = vmatprep.subr.bf16.mxu0 %v2662_v9  ;;  %2411 = vmatprep.mubr.msk.bf16.mxu1 %vm2663_vm1, %v2662_v9 }
 0x178   : > { %2374 = vmatpush3.bf16.msra.mxu0 %v2559_v39 }
 0x179   : > { %2387 = vmatprep.subr.bf16.mxu0 %v2662_v9 }
 0x17b   : > { %2376 = vmatmul.mubr.msk.bf16.vlgmr.msra.gmra.mxu0 %vm494_vm0, %v2840_v23 }
 0x17c   : > { %2388 = vmatpush3.bf16.msra.mxu0 %v2560_v40  ;;  %2391 = vmatprep.mubr.msk.bf16.mxu0 %vm2663_vm1, %v2662_v9 }
 0x17d   : > { %2389 = vmatprep.subr.bf16.mxu0 %v2662_v9 }
 0x180   : > { %2390 = vmatpush3.bf16.msra.mxu0 %v2561_v41 }
 0x181   : > { %2403 = vmatprep.subr.bf16.mxu0 %v2662_v9 }
 0x183   : > { %2392 = vmatmul.mubr.msk.bf16.vlgmr.msra.gmra.mxu0 %vm494_vm0, %v2840_v23 }
 0x184   : > { %2405 = vmatprep.mubr.msk.bf16.mxu0 %vm2663_vm1, %v2662_v9 }
 0x213   : > { %v2964_v42 = vpop.f32.mrf.mxu0  ;;  %v745_v43 = vpop.f32.mrf.mxu1 }
 0x214   : > { %v1202_v11 = vpack.c.bf16 %v745_v43, %v745_v43  ;;  %v1199_v24 = vpack.c.bf16 %v2964_v42, %v2964_v42 }
 0x215   : > { %v2313_v44 = vpop.f32.mrf.mxu0  ;;  %v2337_v45 = vpop.f32.mrf.mxu1 }
 0x217   : > { %v592_v46 = vpop.f32.mrf.mxu0  ;;  %v748_v47 = vpop.f32.mrf.mxu1 }
 0x219   : > { %v2314_v48 = vpop.f32.mrf.mxu0  ;;  %v2338_v49 = vpop.f32.mrf.mxu1 }
 0x21b   : > { %v641_v50 = vpop.f32.mrf.mxu0  ;;  %v865_v51 = vpop.f32.mrf.mxu1 }
 0x21c   : > { %v1204_v52 = vpack.c.bf16 %v865_v51, %v865_v51  ;;  %v1200_v62 = vpack.c.bf16 %v641_v50, %v641_v50 }
 0x21d   : > { %v2321_v53 = vpop.f32.mrf.mxu0  ;;  %v2353_v54 = vpop.f32.mrf.mxu1 }
 0x21e   : > { %v1258_v55 = vsel %vm1207_vm2, %v1204_v52, 0 }
 0x21f   : > { %v644_v56 = vpop.f32.mrf.mxu0  ;;  %v868_v57 = vpop.f32.mrf.mxu1  ;;  %2410 = vmatpush3.bf16.xpose.msra.mxu1 %v1258_v55 }
 0x220   : > { %2421 = vmatprep.subr.bf16.mxu1 %v2662_v9 }
 0x221   : > { %v2322_v58 = vpop.f32.mrf.mxu0  ;;  %v2354_v59 = vpop.f32.mrf.mxu1 }
 0x223   : > { %v693_v60 = vpop.f32.mrf.mxu0  ;;  %v969_v61 = vpop.f32.mrf.mxu1 }
 0x224   : > { %v1206_v63 = vpack.c.bf16 %v969_v61, %v969_v61  ;;  %v1201_v34 = vpack.c.bf16 %v693_v60, %v693_v60 }
 0x225   : > { %v2329_v1 = vpop.f32.mrf.mxu0  ;;  %v2369_v2 = vpop.f32.mrf.mxu1 }
 0x226   : > { %v1350_v3 = vsel %vm1207_vm2, %v1206_v63, 0  ;;  %2412 = vmatmul.mubr.msk.bf16.vlgmr.msra.gmra.mxu1 %vm1207_vm2, %v1200_v62 }
 0x227   : > { %v696_v4 = vpop.f32.mrf.mxu0  ;;  %v972_v5 = vpop.f32.mrf.mxu1  ;;  %2422 = vmatpush3.bf16.xpose.msra.mxu1 %v1350_v3  ;;  %2423 = vmatprep.mubr.msk.bf16.mxu1 %vm2663_vm1, %v2662_v9 }
 0x228   : > { %2433 = vmatprep.subr.bf16.mxu1 %v2662_v9 }
 0x229   : > { %v2330_v6 = vpop.f32.mrf.mxu0  ;;  %v2370_v7 = vpop.f32.mrf.mxu1 }
 0x22b   : > { %v813_v8 = vpop.f32.mrf.mxu0  ;;  %v1089_v10 = vpop.f32.mrf.mxu1 }
 0x22c   : > { %v1203_v12 = vpack.c.bf16 %v813_v8, %v813_v8  ;;  %v1441_v13 = vpack.c.bf16 %v1089_v10, %v1089_v10 }
 0x22d   : > { %v2345_v14 = vpop.f32.mrf.mxu0  ;;  %v2385_v15 = vpop.f32.mrf.mxu1 }
 0x22e   : > { %v1212_v16 = vsel %vm1207_vm2, %v1203_v12, 0  ;;  %v1495_v17 = vsel %vm1447_vm3, %v1441_v13, 0  ;;  %2424 = vmatmul.mubr.msk.bf16.vlgmr.msra.gmra.mxu1 %vm1207_vm2, %v1202_v11 }
 0x22f   : > { %v816_v18 = vpop.f32.mrf.mxu0  ;;  %v1092_v19 = vpop.f32.mrf.mxu1  ;;  %2404 = vmatpush3.bf16.xpose.msra.mxu0 %v1212_v16  ;;  %2434 = vmatpush3.bf16.msra.mxu1 %v1495_v17 }
 0x230   : > { %2415 = vmatprep.subr.bf16.mxu0 %v2662_v9  ;;  %2435 = vmatprep.mubr.msk.bf16.mxu1 %vm2663_vm1, %v2662_v9 }
 0x231   : > { %v2346_v20 = vpop.f32.mrf.mxu0  ;;  %v2386_v21 = vpop.f32.mrf.mxu1  ;;  %2445 = vmatprep.subr.bf16.mxu1 %v2662_v9 }
 0x233   : > { %v917_v22 = vpop.f32.mrf.mxu0  ;;  %v2980_v23 = vpop.f32.mrf.mxu1 }
 0x234   : > { %v1205_v25 = vpack.c.bf16 %v917_v22, %v917_v22 }
 0x235   : > { %v2361_v26 = vpop.f32.mrf.mxu0  ;;  %v2401_v27 = vpop.f32.mrf.mxu1 }
 0x236   : > { %v1304_v28 = vsel %vm1207_vm2, %v1205_v25, 0  ;;  %2406 = vmatmul.mubr.msk.bf16.vlgmr.msra.gmra.mxu0 %vm1207_vm2, %v1199_v24 }
 0x237   : > { %v920_v29 = vpop.f32.mrf.mxu0  ;;  %v1196_v30 = vpop.f32.mrf.mxu1  ;;  %2416 = vmatpush3.bf16.xpose.msra.mxu0 %v1304_v28  ;;  %2417 = vmatprep.mubr.msk.bf16.mxu0 %vm2663_vm1, %v2662_v9 }
 0x238   : > { %2427 = vmatprep.subr.bf16.mxu0 %v2662_v9 }
 0x239   : > { %v2362_v31 = vpop.f32.mrf.mxu0  ;;  %v2402_v32 = vpop.f32.mrf.mxu1 }
 0x23a   : > { %v1443_v32 = vpack.c.bf16 %v2980_v23, %v2980_v23  ;;  %v1633_v23 = vld [vmem:[%s3178_s7] sm:$0xf] }
 0x23b   : > { %v1037_v33 = vpop.f32.mrf.mxu0 }
 0x23c   : > { %v1440_v35 = vpack.c.bf16 %v1037_v33, %v1037_v33 }
 0x23d   : > { %v2377_v36 = vpop.f32.mrf.mxu0 }
 0x23e   : > { %v1449_v37 = vsel %vm1447_vm3, %v1440_v35, 0  ;;  %2418 = vmatmul.mubr.msk.bf16.vlgmr.msra.gmra.mxu0 %vm1207_vm2, %v1201_v34 }
 0x23f   : > { %v1040_v38 = vpop.f32.mrf.mxu0  ;;  %2428 = vmatpush3.bf16.msra.mxu0 %v1449_v37  ;;  %2429 = vmatprep.mubr.msk.bf16.mxu0 %vm2663_vm1, %v2662_v9 }
 0x240   : > { %2439 = vmatprep.subr.bf16.mxu0 %v2662_v9  ;;  %v1587_v38 = vsel %vm1447_vm3, %v1443_v32, 0 }
 0x241   : > { %v2378_v39 = vpop.f32.mrf.mxu0 }
 0x243   : > { %v2994_v40 = vpop.f32.mrf.mxu0 }
 0x244   : > { %v1442_v28 = vpack.c.bf16 %v2994_v40, %v2994_v40 }
 0x245   : > { %v2393_v41 = vpop.f32.mrf.mxu0 }
 0x246   : > { %v1541_v33 = vsel %vm1447_vm3, %v1442_v28, 0 }
 0x247   : > { %v1144_v42 = vpop.f32.mrf.mxu0 }
 0x248   : > { %v1641_v42 = vsel %vm1447_vm3, %v1633_v23, 0 }
 0x249   : > { %v2394_v43 = vpop.f32.mrf.mxu0 }
 0x2e6   : > { %v1294_v44 = vpop.f32.mrf.mxu1 }
 0x2e7   : > { %v1395_v56 = vsel %vm1207_vm2, %v1294_v44, -inf }
 0x2e8   : > { %v2413_v45 = vpop.f32.mrf.mxu1 }
 0x2ea   : > { %v1297_v46 = vpop.f32.mrf.mxu1 }
 0x2eb   : > { %v1635_v46 = vld [vmem:[%s3178_s7 + $0x8] sm:$0xf] }
 0x2ec   : > { %v2414_v47 = vpop.f32.mrf.mxu1 }
 0x2ee   : > { %v1386_v48 = vpop.f32.mrf.mxu1 }
 0x2ef   : > { %v1401_v59 = vsel %vm1207_vm2, %v1386_v48, -inf }
 0x2f0   : > { %v2425_v49 = vpop.f32.mrf.mxu1 }
 0x2f1   : > { %v1733_v49 = vsel %vm1447_vm3, %v1635_v46, 0 }
 0x2f2   : > { %v1389_v50 = vpop.f32.mrf.mxu1 }
 0x2f4   : > { %v2426_v51 = vpop.f32.mrf.mxu1 }
 0x2f5   : > { %v1636_v51 = vld [vmem:[%s3178_s7 + $0xc] sm:$0xf] }
 0x2f6   : > { %v1248_v52 = vpop.f32.mrf.mxu0 }
 0x2f7   : > { %v1392_v53 = vsel %vm1207_vm2, %v1248_v52, -inf }
 0x2f8   : > { %1393 = vmax.xlane.f32.xlu1 %v1392_v53  ;;  %v2407_v54 = vpop.f32.mrf.mxu0 }
 0x2fa   : > { %v1251_v55 = vpop.f32.mrf.mxu0 }
 0x2fb   : > { %v1779_v55 = vsel %vm1447_vm3, %v1636_v51, 0 }
 0x2fc   : > { %1396 = vmax.xlane.f32.xlu1 %v1395_v56  ;;  %v2408_v57 = vpop.f32.mrf.mxu0 }
 0x2fe   : > { %v1340_v58 = vpop.f32.mrf.mxu0 }
 0x2ff   : > { %v1398_v60 = vsel %vm1207_vm2, %v1340_v58, -inf }
 0x300   : > { %1402 = vmax.xlane.f32.xlu1 %v1401_v59  ;;  %1399 = vmax.xlane.f32.xlu0 %v1398_v60  ;;  %v2419_v61 = vpop.f32.mrf.mxu0 }
 0x302   : > { %v1343_v62 = vpop.f32.mrf.mxu0 }
 0x304   : > { %v2420_v63 = vpop.f32.mrf.mxu0 }
 0x381   : > { %v1394_v1 = vpop.xlane.xlu1 %1393 }
 0x382   : > { %v1404_v2 = vsub.f32 %v1248_v52, %v1394_v1 }
 0x384   : > { %v1408_v3 = vmul.f32 1.442695, %v1404_v2 }
 0x385   : > { %v1397_v4 = vpop.xlane.xlu1 %1396 }
 0x386   : > { %2578 = vpow2.f32 %v1408_v3  ;;  %v1405_v5 = vsub.f32 %v1294_v44, %v1397_v4  ;;  %v1634_v44 = vld [vmem:[%s3178_s7 + $0x4] sm:$0xf] }
 0x387   : > { %v1687_v45 = vsel %vm1447_vm3, %v1634_v44, 0 }
 0x388   : > { %v1410_v6 = vmul.f32 1.442695, %v1405_v5 }
 0x389   : > { %v1403_v7 = vpop.xlane.xlu1 %1402  ;;  %v1400_v8 = vpop.xlane.xlu0 %1399 }
 0x38a   : > { %2580 = vpow2.f32 %v1410_v6  ;;  %v1407_v10 = vsub.f32 %v1386_v48, %v1403_v7  ;;  %v1406_v11 = vsub.f32 %v1340_v58, %v1400_v8 }
 0x38c   : > { %v1414_v12 = vmul.f32 1.442695, %v1407_v10  ;;  %v1412_v13 = vmul.f32 1.442695, %v1406_v11 }
 0x38e   : > { %2582 = vpow2.f32 %v1414_v12 }
 0x38f   : > { %2584 = vpow2.f32 %v1412_v13 }
 0x393   : > { %v2579_v14 = vpop.eup %2578 }
 0x394   : > { %v1416_v15 = vsel %vm1207_vm2, %v2579_v14, 0.0 }
 0x395   : > { %1417 = vadd.xlane.f32.xlu0 %v1416_v15 }
 0x397   : > { %v2581_v16 = vpop.eup %2580 }
 0x398   : > { %v1419_v17 = vsel %vm1207_vm2, %v2581_v16, 0.0 }
 0x399   : > { %1420 = vadd.xlane.f32.xlu1 %v1419_v17 }
 0x39b   : > { %v2583_v18 = vpop.eup %2582 }
 0x39c   : > { %v2585_v19 = vpop.eup %2584  ;;  %v1425_v20 = vsel %vm1207_vm2, %v2583_v18, 0.0 }
 0x39d   : > { %1426 = vadd.xlane.f32.xlu1 %v1425_v20  ;;  %v1422_v21 = vsel %vm1207_vm2, %v2585_v19, 0.0 }
 0x39e   : > { %1423 = vadd.xlane.f32.xlu0 %v1422_v21 }
 0x41e   : > { %v1418_v22 = vpop.xlane.xlu0 %1417 }
 0x41f   : > { %2586 = vrcp.f32 %v1418_v22 }
 0x422   : > { %v1421_v24 = vpop.xlane.xlu1 %1420 }
 0x423   : > { %2588 = vrcp.f32 %v1421_v24 }
 0x426   : > { %v1427_v25 = vpop.xlane.xlu1 %1426 }
 0x427   : > { %2590 = vrcp.f32 %v1427_v25  ;;  %v1424_v26 = vpop.xlane.xlu0 %1423 }
 0x428   : > { %2592 = vrcp.f32 %v1424_v26 }
 0x42c   : > { %v2587_v27 = vpop.eup %2586 }
 0x42d   : > { %v1432_v29 = vmul.f32 %v2587_v27, %v2579_v14  ;;  %v2217_v27 = vld [vmem:[%s3179_s8] ss:$0 sm:$0xff] }
 0x42f   : > { %v1436_v30 = vpack.c.bf16 %v1432_v29, %v1432_v29 }
 0x430   : > { %v2589_v31 = vpop.eup %2588 }
 0x431   : > { %2430 = vmatmul.mubr.msk.bf16.vlgmr.msra.gmra.mxu0 %vm1207_vm2, %v1436_v30  ;;  %v1433_v34 = vmul.f32 %v2589_v31, %v2581_v16 }
 0x432   : > { %2440 = vmatpush3.bf16.msra.mxu0 %v1541_v33  ;;  %2441 = vmatprep.mubr.msk.bf16.mxu0 %vm2663_vm1, %v2662_v9 }
 0x433   : > { %v1437_v35 = vpack.c.bf16 %v1433_v34, %v1433_v34  ;;  %2451 = vmatprep.subr.bf16.mxu0 %v2662_v9 }
 0x434   : > { %v2591_v36 = vpop.eup %2590 }
 0x435   : > { %v2593_v37 = vpop.eup %2592  ;;  %2436 = vmatmul.mubr.msk.bf16.vlgmr.msra.gmra.mxu1 %vm1207_vm2, %v1437_v35  ;;  %v1435_v40 = vmul.f32 %v2591_v36, %v2583_v18 }
 0x436   : > { %2446 = vmatpush3.bf16.msra.mxu1 %v1587_v38  ;;  %v1434_v39 = vmul.f32 %v2593_v37, %v2585_v19  ;;  %2447 = vmatprep.mubr.msk.bf16.mxu1 %vm2663_vm1, %v2662_v9 }
 0x437   : > { %2457 = vmatprep.subr.bf16.mxu1 %v2662_v9  ;;  %v1439_v43 = vpack.c.bf16 %v1435_v40, %v1435_v40  ;;  %v2564_v40 = vld [vmem:[%s3182_s11 + $0x14] ss:$8 sps:$4 sm:$0xff]  }
 0x438   : > { %v1438_v41 = vpack.c.bf16 %v1434_v39, %v1434_v39 }
 0x43a   : > { %2442 = vmatmul.mubr.msk.bf16.vlgmr.msra.gmra.mxu0 %vm1207_vm2, %v1438_v41  ;;  %v2567_v41 = vld [vmem:[%s3182_s11 + $0x4] ss:$8 sps:$4 sm:$0xff]  }
 0x43b   : > { %2452 = vmatpush3.bf16.msra.mxu0 %v1641_v42  ;;  %2453 = vmatprep.mubr.msk.bf16.mxu0 %vm2663_vm1, %v2662_v9  ;;  %v2565_v42 = vld [vmem:[%s3182_s11] ss:$8 sps:$4 sm:$0xff]  }
 0x43c   : > { %2463 = vmatprep.subr.bf16.mxu0 %v2662_v9 }
 0x43d   : > { %2448 = vmatmul.mubr.msk.bf16.vlgmr.msra.gmra.mxu1 %vm1207_vm2, %v1439_v43  ;;  %v2664_v43 = vmov 0  }
 0x43e   : > { %2459 = vmatprep.mubr.msk.bf16.mxu1 %vm2663_vm1, %v2662_v9  ;;  %2458 = vmatpush3.bf16.msra.mxu1 %v1687_v45 }
 0x43f   : > { %2469 = vmatprep.subr.bf16.mxu1 %v2662_v9 }
 0x4f1   : > { %v1485_v47 = vpop.f32.mrf.mxu0 }
 0x4f2   : > { %v1629_v48 = vpack.c.bf16 %v1485_v47, %v1485_v47 }
 0x4f3   : > { %v2431_v50 = vpop.f32.mrf.mxu0 }
 0x4f4   : > { %2454 = vmatmul.mubr.msk.bf16.vlgmr.msra.gmra.mxu0 %vm1207_vm2, %v1629_v48  ;;  %v2218_v48 = vld [vmem:[%s3180_s9] ss:$0 sm:$0xff] }
 0x4f5   : > { %v1488_v52 = vpop.f32.mrf.mxu0  ;;  %v1531_v53 = vpop.f32.mrf.mxu1  ;;  %2464 = vmatpush3.bf16.msra.mxu0 %v1733_v49  ;;  %2465 = vmatprep.mubr.msk.bf16.mxu0 %vm2663_vm1, %v2662_v9  ;;  %v2219_v50 = vld [vmem:[%s3181_s10] ss:$0 sm:$0xff] }
 0x4f6   : > { %v1630_v54 = vpack.c.bf16 %v1531_v53, %v1531_v53  ;;  %1918 = vmatprep.subr.bf16.mxu0 %v2564_v40 }
 0x4f7   : > { %v2432_v56 = vpop.f32.mrf.mxu0  ;;  %v2437_v57 = vpop.f32.mrf.mxu1 }
 0x4f8   : > { %2460 = vmatmul.mubr.msk.bf16.vlgmr.msra.gmra.mxu1 %vm1207_vm2, %v1630_v54  ;;  %v2568_v54 = vld [vmem:[%s3184_s13 + $0x38] sm:$0xff]   ;;  %v2570_v56 = vld [vmem:[%s3184_s13 + $0x28] sm:$0xff]   ;;  %v2571_v57 = vld [vmem:[%s3184_s13 + $0x20] sm:$0xff]  }
 0x4f9   : > { %v1534_v58 = vpop.f32.mrf.mxu1  ;;  %2470 = vmatpush3.bf16.msra.mxu1 %v1779_v55  ;;  %2471 = vmatprep.mubr.msk.bf16.mxu1 %vm2663_vm1, %v2662_v9  ;;  %v2569_v55 = vld [vmem:[%s3184_s13 + $0x30] sm:$0xff]  }
 0x4fa   : > { %v1577_v59 = vpop.f32.mrf.mxu0  ;;  %2475 = vmatprep.subr.bf16.mxu1 %v2662_v9  ;;  %v2572_v58 = vld [vmem:[%s3184_s13 + $0x18] sm:$0xff]  }
 0x4fb   : > { %v1631_v60 = vpack.c.bf16 %v1577_v59, %v1577_v59  ;;  %v2438_v61 = vpop.f32.mrf.mxu1  ;;  %v2573_v59 = vld [vmem:[%s3184_s13 + $0x10] sm:$0xff]  }
 0x4fc   : > { %v2443_v62 = vpop.f32.mrf.mxu0  ;;  %v2575_v61 = vld [vmem:[%s3184_s13] sm:$0xff]  }
 0x4fd   : > { %2466 = vmatmul.mubr.msk.bf16.vlgmr.msra.gmra.mxu0 %vm1207_vm2, %v1631_v60  ;;  %v1623_v63 = vpop.f32.mrf.mxu1  ;;  %v2574_v60 = vld [vmem:[%s3184_s13 + $0x8] sm:$0xff]   ;;  %v1873_v62 = vlaneseq }
 0x4fe   : > { %v1580_v1 = vpop.f32.mrf.mxu0  ;;  %v1632_v2 = vpack.c.bf16 %v1623_v63, %v1623_v63  ;;  %1938 = vmatprep.mubr.bf16.mxu0 %v2664_v43 }
 0x4ff   : > { %v2449_v3 = vpop.f32.mrf.mxu1  ;;  %v1874_v63 = vshrl.u32 %v1873_v62, 7 }
 0x500   : > { %v2444_v4 = vpop.f32.mrf.mxu0  ;;  %2472 = vmatmul.mubr.msk.bf16.vlgmr.msra.gmra.mxu1 %vm1207_vm2, %v1632_v2  ;;  %v1871_v2 = vld [vmem:[%s3183_s12] sm:$0x3] }
 0x501   : > { %v1626_v5 = vpop.f32.mrf.mxu1  ;;  %2491 = vmatprep.mubr.msk.bf16.mxu1 %vm2663_vm1, %v2662_v9  ;;  %2476 = vmatpush3.bf16.msra.mxu1 %v2568_v54  ;;  %v1879_v1 = vsub.s32 1, %v1874_v63 }
 0x502   : > { %2477 = vmatprep.subr.bf16.mxu1 %v2662_v9 }
 0x503   : > { %v2450_v6 = vpop.f32.mrf.mxu1  ;;  %v1880_v3 = vrot.slane %v1871_v2, %v1879_v1 }
 0x505   : > { %2478 = vmatpush3.bf16.msra.mxu1 %v2569_v55 }
 0x506   : > { %2479 = vmatprep.subr.bf16.mxu1 %v2662_v9 }
 0x509   : > { %2480 = vmatpush3.bf16.msra.mxu1 %v2570_v56 }
 0x50a   : > { %2481 = vmatprep.subr.bf16.mxu1 %v2662_v9 }
 0x50d   : > { %2482 = vmatpush3.bf16.msra.mxu1 %v2571_v57 }
 0x50e   : > { %2483 = vmatprep.subr.bf16.mxu1 %v2662_v9 }
 0x511   : > { %2484 = vmatpush3.bf16.msra.mxu1 %v2572_v58 }
 0x512   : > { %2485 = vmatprep.subr.bf16.mxu1 %v2662_v9 }
 0x515   : > { %2486 = vmatpush3.bf16.msra.mxu1 %v2573_v59 }
 0x516   : > { %2487 = vmatprep.subr.bf16.mxu1 %v2662_v9 }
 0x519   : > { %2488 = vmatpush3.bf16.msra.mxu1 %v2574_v60 }
 0x51a   : > { %2489 = vmatprep.subr.bf16.mxu1 %v2662_v9 }
 0x51d   : > { %2490 = vmatpush3.bf16.msra.mxu1 %v2575_v61 }
 0x5b4   : > { %v1677_v7 = vpop.f32.mrf.mxu0 }
 0x5b5   : > { %v1821_v16 = vsel %vm494_vm0, %v1677_v7, 0.0 }
 0x5b6   : > { %v2455_v8 = vpop.f32.mrf.mxu0 }
 0x5b8   : > { %v1680_v10 = vpop.f32.mrf.mxu0  ;;  %v1723_v11 = vpop.f32.mrf.mxu1 }
 0x5b9   : > { %v1822_v14 = vsel %vm494_vm0, %v1723_v11, 0.0 }
 0x5ba   : > { %v2456_v12 = vpop.f32.mrf.mxu0  ;;  %v2461_v13 = vpop.f32.mrf.mxu1  ;;  %v1823_v18 = vadd.f32 %v1822_v14, %v1821_v16 }
 0x5bc   : > { %v1726_v15 = vpop.f32.mrf.mxu1 }
 0x5bd   : > { %v1769_v17 = vpop.f32.mrf.mxu0 }
 0x5be   : > { %v1824_v19 = vsel %vm494_vm0, %v1769_v17, 0.0  ;;  %v2462_v20 = vpop.f32.mrf.mxu1 }
 0x5bf   : > { %v2467_v21 = vpop.f32.mrf.mxu0  ;;  %v1825_v22 = vadd.f32 %v1824_v19, %v1823_v18 }
 0x5c0   : > { %v1815_v24 = vpop.f32.mrf.mxu1 }
 0x5c1   : > { %v1772_v25 = vpop.f32.mrf.mxu0  ;;  %v1826_v26 = vsel %vm494_vm0, %v1815_v24, 0.0 }
 0x5c2   : > { %v1827_v28 = vadd.f32 %v1826_v26, %v1825_v22  ;;  %v2473_v29 = vpop.f32.mrf.mxu1 }
 0x5c3   : > { %v2468_v30 = vpop.f32.mrf.mxu0 }
 0x5c4   : > { %v1835_v31 = vadd.f32 %v2217_v27, %v1827_v28  ;;  %v1818_v32 = vpop.f32.mrf.mxu1  ;;  %v1875_v28 = vsub.s32 0, %v1874_v63 }
 0x5c6   : > { %v2474_v33 = vpop.f32.mrf.mxu1  ;;  %v3061_v34 = vadd.f32 %v1835_v31, %v2800_v0  ;;  %v2562_v0 = vld [vmem:[%s3182_s11 + $0x10] ss:$8 sps:$4 sm:$0xff]   ;;  %v2665_v31 = vmov -1.0  }
 0x5c7   : > { %1919 = vmatpush1.bf16.msra.mxu0 %v2562_v0  ;;  %v1876_v33 = vrot.slane %v1871_v2, %v1875_v28  ;;  %v2225_v0 = vld [vmem:[%s3185_s14] ss:$0 sm:$0xff] }
 0x5c8   : > { %v1839_v35 = vsel %vm494_vm0, %v3061_v34, 0.0  ;;  %1920 = vmatprep.subr.bf16.mxu0 %v2567_v41 }
 0x5c9   : > { %1840 = vadd.xlane.f32.xlu0 %v1839_v35 }
 0x5cb   : > { %1921 = vmatpush1.bf16.msra.mxu0 %v2565_v42 }
 0x652   : > { %v1841_v36 = vpop.xlane.xlu0 %1840 }
 0x653   : > { %v1842_v37 = vmul.f32 0.03125, %v1841_v36 }
 0x655   : > { %v1843_v38 = vsub.f32 %v3061_v34, %v1842_v37 }
 0x657   : > { %v1844_v23 = vmul.f32 %v1843_v38, %v1843_v38 }
 0x659   : > { %v1845_v39 = vsel %vm494_vm0, %v1844_v23, 0.0 }
 0x65a   : > { %1846 = vadd.xlane.f32.xlu1 %v1845_v39 }
 0x6e3   : > { %v1847_v44 = vpop.xlane.xlu1 %1846 }
 0x6e4   : > { %v1848_v45 = vmul.f32 0.03125, %v1847_v44 }
 0x6e6   : > { %v1849_v46 = vadd.f32 1e-05, %v1848_v45 }
 0x6e8   : > { %2594 = vrsqrt.f32 %v1849_v46 }
 0x6f5   : > { %v2595_v47 = vpop.eup %2594 }
 0x6f6   : > { %v1851_v49 = vmul.f32 %v2595_v47, %v1843_v38 }
 0x6f8   : > { %v1858_v51 = vmul.f32 %v2218_v48, %v1851_v49 }
 0x6fa   : > { %v1865_v52 = vadd.f32 %v2219_v50, %v1858_v51 }
 0x6fc   : > { %v1866_v53 = vpack.c.bf16 %v1865_v52, %v1865_v52 }
 0x6fe   : > { %2224 = vmatmul.mubr.msk.bf16.vlgmr.msra.gmra.mxu0 %vm494_vm0, %v1866_v53 }
 0x7be   : > { %v1940_v4 = vpop.f32.mrf.mxu0 }
 0x7bf   : > { %v1941_v38 = vadd.f32 %v1940_v4, %v1876_v33 }
 0x7c0   : > { %v1942_v5 = vpop.f32.mrf.mxu0 }
 0x7c1   : > { %v1943_v6 = vadd.f32 %v1942_v5, %v1880_v3 }
 0x7c2   : > { %v1944_v7 = vpop.f32.mrf.mxu0 }
 0x7c3   : > { %v1948_v8 = vmul.f32 0.70710677, %v1943_v6  ;;  %v1947_v36 = vmul.f32 0.5, %v1943_v6 }
 0x7c4   : > { %v1945_v10 = vpop.f32.mrf.mxu0 }
 0x7c5   : > { %v1951_v9 = vand.u32 2147483647, %v1948_v8  ;;  %vm1949_vm4 = vcmp.ge.f32.partialorder %v1948_v8, 0.0 }
 0x7c6   : > { %v1950_v32 = vsel %vm1949_vm4, 1.0, %v2665_v31 }
 0x7c7   : > { %v1952_v11 = vmul.f32 0.3275911, %v1951_v9  ;;  %v1964_v13 = vsub.f32 0.0, %v1951_v9 }
 0x7c9   : > { %v1953_v12 = vadd.f32 1.0, %v1952_v11  ;;  %v1965_v14 = vmul.f32 %v1964_v13, %v1951_v9 }
 0x7cb   : > { %2596 = vrcp.f32 %v1953_v12  ;;  %v1966_v17 = vmul.f32 1.442695, %v1965_v14 }
 0x7cd   : > { %2598 = vpow2.f32 %v1966_v17 }
 0x7d8   : > { %v2597_v15 = vpop.eup %2596 }
 0x7d9   : > { %v1955_v16 = vmul.f32 1.0614054, %v2597_v15 }
 0x7da   : > { %v2599_v27 = vpop.eup %2598 }
 0x7db   : > { %v1956_v18 = vadd.f32 -1.4531521, %v1955_v16 }
 0x7dd   : > { %v1957_v19 = vmul.f32 %v2597_v15, %v1956_v18 }
 0x7df   : > { %v1958_v20 = vadd.f32 1.4214138, %v1957_v19 }
 0x7e1   : > { %v1959_v21 = vmul.f32 %v2597_v15, %v1958_v20 }
 0x7e3   : > { %v1960_v22 = vadd.f32 -0.28449672, %v1959_v21 }
 0x7e5   : > { %v1961_v24 = vmul.f32 %v2597_v15, %v1960_v22 }
 0x7e7   : > { %v1962_v25 = vadd.f32 0.2548296, %v1961_v24 }
 0x7e9   : > { %v1963_v26 = vmul.f32 %v2597_v15, %v1962_v25 }
 0x7eb   : > { %v1968_v29 = vmul.f32 %v2599_v27, %v1963_v26 }
 0x7ed   : > { %v1969_v30 = vsub.f32 1.0, %v1968_v29 }
 0x7ef   : > { %v1970_v35 = vmul.f32 %v1969_v30, %v1950_v32 }
 0x7f1   : > { %v1971_v37 = vadd.f32 1.0, %v1970_v35 }
 0x7f3   : > { %v1972_v23 = vmul.f32 %v1971_v37, %v1947_v36 }
 0x7f5   : > { %v1973_v39 = vmul.f32 %v1972_v23, %v1941_v38 }
 0x7f7   : > { %v1974_v40 = vpack.c.bf16 %v1973_v39, %v1973_v39 }
 0x7f9   : > { %2492 = vmatmul.mubr.bf16.vlgmr.msra.gmra.mxu1 %v1974_v40 }
 0x8b9   : > { %v2080_v41 = vpop.f32.mrf.mxu1 }
 0x8ba   : > { %v2081_v42 = vadd.f32 %v2225_v0, %v2080_v41 }
 0x8bb   : > { %v2493_v43 = vpop.f32.mrf.mxu1 }
 0x8bc   : > { %v2086_v44 = vadd.f32 %v2081_v42, %v3061_v34 }
 0x8bd   : > { %v2083_v45 = vpop.f32.mrf.mxu1 }
 0x8be   : > { %2087 = vst.msk [vmem:[%s485_s28] sm:$0xff] %vm494_vm0, %v2086_v44 }
 0x8bf   : > { %v2494_v46 = vpop.f32.mrf.mxu1 }
 0x8c0   : > { %2613 = shalt.err (!%p2610_p3)
}
 0x8c1   : > { %s2614_s24 = scalar_lea.hbm %s3129_s3, 128  ;;  %s2618_s30 = scalar_lea.hbm %s3186_s15, 256 }
 0x8c2   : > { %p2615_p4 = scmp.ne.s32.totalorder %s3129_s3, %s2614_s24  ;;  %p2619_p9 = scmp.lt.s32.totalorder %s3129_s3, %s3186_s15 }
 0x8c3   : > { %p2620_p10 = scmp.lt.s32.totalorder %s2618_s30, %s2614_s24 }
 0x8c4   : > { %p2616_p7 = pnand %p2615_p4, %p2785_p5 }
 0x8c5   : > { %p2621_p11 = por %p2620_p10, %p2619_p9 }
 0x8c6   : > { %p2617_p8 = pneg %p2616_p7 }
 0x8c8   : > { %p2622_p12 = pnand %p2621_p11, %p2617_p8 }
 0x8ca   : > { %2625 = shalt.err (!%p2622_p12)
}
 0x8cb   : > { %2495 = dma.vmem_to_hbm [thread:$0]  (%p2785_p5), %s3131_s29, 128, %s3129_s3, %s2089_s20  }
 0x8cc PF: > { %p2501_p13 = scmp.ge.s32.totalorder %s2660_s19, 2  ;;  %s2114_s16 = sand.u32 1, %s2648_s17  }
 0x8cd   : > { %s2115_s4 = scalar_lea.sflag [#allocation3], %s2114_s16 }
 0x8ce   : > { %p2498_p0 = pnand %p2501_p13, %p2789_p6 }
 0x8d0   : > { %p2499_p1 = pneg %p2498_p0 }
 0x8d2   : > { %2643 = dma.done.wait (%p2499_p1), %s2115_s4, 128  }
 0x8d3   : > { %2645 = vsyncadd (%p2499_p1), %s2115_s4, 4294967168  ;;  %p25_p2 = scmp.ge.s32.totalorder %s2772_s22, 4   ;;  %s3197_s17 = smov %s2652_s1 }
 0x8d4   : > { %s3198_s1 = smov %s2656_s18  ;;  %s3199_s18 = smov %s2783_s25 }
 0x8d5   : > { %s3200_s19 = smov %s2772_s22  ;;  %27 = sbr.rel (!%p25_p2) target bundleno = 8 (0x8), region = 115 }
 0x8da   :  { %2120 = vsyncpa [#allocation3], 1 }
 0x8db   :  { %2122 = vsyncpa [#allocation3 + $0x1], 1 }

</bundles_post_ra>
